<compile_context>
chip_gen: v6e
topology: v6e:2x2x1
jax: 0.10.0
libtpu: 0.0.40
codegen_flags: <defaults>
</compile_context>

<pallas_src>
import jax
import jax.numpy as jnp
from jax.experimental import pallas as pl
from jax.experimental.pallas import tpu as pltpu

LANES = 128                       # vreg lane width (last dim of the slab)
MAX_TILE_BYTES = 4 * 1024 * 1024  # per-buffer tile size; x2 buffers x (in+out) = 16 MiB


def _round_up(a: int, b: int) -> int:
    return ((a + b - 1) // b) * b


def _mish_kernel(x_ref, o_ref):
    # mish(x) = x * tanh(softplus(x)) = x * w*(w+2) / (w*(w+2) + 2),  w = exp(x)
    # Compute in f32. exp rides the EUP; the exact divide + muls are free
    # filler in this HBM-bound streamer (no approx reciprocal — accuracy).
    x = x_ref[...].astype(jnp.float32)
    # Clamp before exp so it never overflows; for x > 20 tanh(softplus(x))
    # has saturated to 1.0 in f32, so mish(x) == x exactly.
    w = jnp.exp(jnp.minimum(x, 20.0))
    num = w * (w + 2.0)
    t = num / (num + 2.0)
    y = jnp.where(x > 20.0, x, x * t)
    o_ref[...] = y.astype(o_ref.dtype)


def _mish_slab(slab: jax.Array) -> jax.Array:
    """Runs the mish kernel over a lane-dense (rows, 128) slab."""
    rows, lanes = slab.shape
    assert lanes == LANES
    dtype = slab.dtype
    itemsize = jnp.dtype(dtype).itemsize
    packing = max(8, 32 // itemsize)            # f32: 8, bf16: 16, int8/fp8: 32
    max_tile_rows = MAX_TILE_BYTES // (LANES * itemsize)

    # >= 2 grid steps whenever the slab is splittable, so v7x's two
    # TensorCores both stream (dimension_semantics=("parallel",)).
    num_tiles = pl.cdiv(rows, max_tile_rows)
    if rows >= 2 * packing:
        num_tiles = max(num_tiles, 2)
    tile_rows = min(rows, _round_up(pl.cdiv(rows, num_tiles), packing))
    grid = (pl.cdiv(rows, tile_rows),)

    n_elems = rows * LANES
    cost = pl.CostEstimate(
        flops=7 * n_elems,
        transcendentals=n_elems,
        bytes_accessed=2 * n_elems * itemsize,
    )

    return pl.pallas_call(
        _mish_kernel,
        out_shape=jax.ShapeDtypeStruct((rows, LANES), dtype),
        grid_spec=pltpu.PrefetchScalarGridSpec(
            num_scalar_prefetch=0,
            grid=grid,
            # NOTE: pipeline_mode=pl.Buffered(3) only if xprof shows exposed
            # DMA gaps; default double-buffering is enough for pure streaming.
            in_specs=[pl.BlockSpec((tile_rows, LANES), lambda i: (i, 0))],
            out_specs=pl.BlockSpec((tile_rows, LANES), lambda i: (i, 0)),
        ),
        compiler_params=pltpu.CompilerParams(
            dimension_semantics=("parallel",),
            vmem_limit_bytes=32 * 1024 * 1024,
        ),
        cost_estimate=cost,
    )(slab)


def mish(x: jax.Array) -> jax.Array:
    """Applies Mish elementwise to an arbitrarily-shaped array via Pallas."""
    orig_shape = x.shape
    dtype = x.dtype
    n = x.size
    if n == 0:
        return x

    itemsize = jnp.dtype(dtype).itemsize
    packing = max(8, 32 // itemsize)
    granule = packing * LANES                   # one fully-packed (packing, 128) tile

    flat = x.reshape(-1)
    aligned = (n // granule) * granule
    rem = n - aligned

    pieces = []
    if aligned > 0:
        # Fast path for the aligned prefix: pure reshape in/out, no pad/slice
        # copies — the kernel's own 1 read + 1 write is the only HBM traffic.
        rows = aligned // LANES
        out_main = _mish_slab(flat[:aligned].reshape(rows, LANES))
        if rem == 0:
            return out_main.reshape(orig_shape)
        pieces.append(out_main.reshape(-1))
    if rem > 0:
        # Sub-granule tail (< granule elements): pad to one packed tile and run
        # it through the same kernel; the pad/slice here touch < 4 KiB.
        tail = flat[aligned:]
        pad = granule - rem
        tail_slab = jnp.concatenate(
            [tail, jnp.zeros((pad,), dtype=dtype)]
        ).reshape(packing, LANES)
        pieces.append(_mish_slab(tail_slab).reshape(-1)[:rem])

    out = pieces[0] if len(pieces) == 1 else jnp.concatenate(pieces)
    return out.reshape(orig_shape)


def _mish_reference(x: jax.Array) -> jax.Array:
    xf = x.astype(jnp.float32)
    return (xf * jnp.tanh(jax.nn.softplus(xf))).astype(x.dtype)


if __name__ == "__main__":
    key = jax.random.PRNGKey(0)
    k0, k1, k2 = jax.random.split(key, 3)

    # NCHW f32 activation, consistent with typical conv activations (fast path).
    x = jax.random.normal(k0, (2, 4, 16, 16), dtype=jnp.float32) * 3.0
    y = jax.block_until_ready(mish(x))
    y_ref = _mish_reference(x)
    assert y.shape == x.shape and y.dtype == x.dtype
    assert jnp.allclose(y, y_ref, atol=2e-4, rtol=2e-4), "mismatch vs reference"

    # Ragged-size input exercises the sub-granule tail path.
    x2 = jax.random.normal(k1, (3, 5, 7), dtype=jnp.float32) * 3.0
    y2 = jax.block_until_ready(mish(x2))
    y2_ref = _mish_reference(x2)
    assert y2.shape == x2.shape and y2.dtype == x2.dtype
    assert jnp.allclose(y2, y2_ref, atol=2e-4, rtol=2e-4), "mismatch (ragged)"

    # bf16 activation exercises dtype-aware tiling (16-row packing, 2 grid steps).
    x3 = (jax.random.normal(k2, (2, 16, 128), dtype=jnp.float32) * 3.0).astype(jnp.bfloat16)
    y3 = jax.block_until_ready(mish(x3))
    y3_ref = _mish_reference(x3)
    assert y3.shape == x3.shape and y3.dtype == jnp.bfloat16
    assert jnp.allclose(y3.astype(jnp.float32), y3_ref.astype(jnp.float32),
                        atol=2e-2, rtol=2e-2), "mismatch (bf16)"

    print("KERNEL_OK")
</pallas_src>

<mosaic_0001>
module attributes {stable_mosaic.version = 11 : i64} {
  func.func @_mish_kernel(%arg0: i32, %arg1: memref<8x128xf32, #tpu.memory_space<vmem>>, %arg2: memref<8x128xf32, #tpu.memory_space<vmem>>) attributes {dimension_semantics = [#tpu.dimension_semantics<parallel>], iteration_bounds = array<i64: 2>, scalar_prefetch = 0 : i64, scratch_operands = 0 : i64, tpu.core_type = #tpu.core_type<tc>, window_params = [{transform_indices = @transform_0, window_bounds = array<i64: 8, 128>}, {transform_indices = @transform_1, window_bounds = array<i64: 8, 128>}]} {
    %c0 = arith.constant 0 : index
    %c0_0 = arith.constant 0 : index
    %0 = vector.load %arg1[%c0, %c0_0] : memref<8x128xf32, #tpu.memory_space<vmem>>, vector<8x128xf32>
    %cst = arith.constant 2.000000e+01 : f32
    %1 = vector.broadcast %cst : f32 to vector<8x128xf32>
    %2 = arith.minimumf %0, %1 : vector<8x128xf32>
    %3 = math.exp %2 : vector<8x128xf32>
    %cst_1 = arith.constant 2.000000e+00 : f32
    %4 = vector.broadcast %cst_1 : f32 to vector<8x128xf32>
    %5 = arith.addf %3, %4 : vector<8x128xf32>
    %6 = arith.mulf %3, %5 : vector<8x128xf32>
    %cst_2 = arith.constant 2.000000e+00 : f32
    %7 = vector.broadcast %cst_2 : f32 to vector<8x128xf32>
    %8 = arith.addf %6, %7 : vector<8x128xf32>
    %9 = arith.divf %6, %8 : vector<8x128xf32>
    %cst_3 = arith.constant 2.000000e+01 : f32
    %10 = vector.broadcast %cst_3 : f32 to vector<8x128xf32>
    %11 = arith.cmpf ogt, %0, %10 : vector<8x128xf32>
    %12 = arith.mulf %0, %9 : vector<8x128xf32>
    %13 = arith.select %11, %0, %12 : vector<8x128xi1>, vector<8x128xf32>
    %c0_4 = arith.constant 0 : index
    %c0_5 = arith.constant 0 : index
    %14 = vector.load %arg2[%c0_4, %c0_5] : memref<8x128xf32, #tpu.memory_space<vmem>>, vector<8x128xf32>
    tpu.vector_store %arg2[%c0_4, %c0_5], %13 {strides = array<i32>} : memref<8x128xf32, #tpu.memory_space<vmem>>, vector<8x128xf32>,
    return
  }
  func.func @transform_0(%arg0: i32) -> (i32, i32) {
    %c0_i32 = arith.constant 0 : i32
    %c0_i32_0 = arith.constant 0 : i32
    return %arg0, %c0_i32 : i32, i32
  }
  func.func @transform_1(%arg0: i32) -> (i32, i32) {
    %c0_i32 = arith.constant 0 : i32
    %c0_i32_0 = arith.constant 0 : i32
    return %arg0, %c0_i32 : i32, i32
  }
}

</mosaic_0001>

<bundles_post_ra>
// kernel: tpu_custom_call.1
= control target key start
LH: loop header
LB: loop body
LE: loop exit
PB: predicated region body
PF: predicated region fallthrough
CT: control target
= control target key end

     0   :  { %6 = vsyncpa [#allocation3], 0  ;;  %s544_s0 = inlined_call_operand.hbm [shape: f32[16,128], index: 0, kind: input, shape index: {}]   ;;  %s545_s1 = inlined_call_operand.hbm [shape: f32[16,128], index: 1, kind: output, shape index: {}]  }
   0x1   :  { %8 = vsyncpa [#allocation3 + $0x1], 0 }
   0x2   :  { %9 = vsyncpa [#allocation4], 0 }
   0x3   :  { %11 = vsyncpa [#allocation4 + $0x1], 0  ;;  %s397_s6 = smov 0   ;;  %s399_s7 = smov 0  }
   0x4   :  { %s401_s8 = smov 0   ;;  %s403_s9 = smov 0  }
   0x5 LB: > { %s418_s10 = sadd.s32 4294967295, %s383_s9   ;;  %s229_s11 = sadd.s32 4294967294, %s383_s9   ;;  %s383_s9 = sphi %s403_s9, %s562_s9   ;;  %s379_s8 = sphi %s401_s8, %s561_s8   ;;  %s375_s7 = sphi %s399_s7, %s560_s7   ;;  %s371_s6 = sphi %s397_s6, %s559_s6  }
   0x6   : > { %s422_s12 = sadd.s32 1, %s383_s9   ;;  %s24_s13 = sadd.s32 1, %s379_s8 }
   0x7   : > { %s21_s14 = ssub.s32 %s383_s9, %s422_s12  ;;  %p31_p0 = scmp.ne.s32.totalorder %s379_s8, %s375_s7 }
   0x8   : > { %p22_p1 = scmp.eq.s32.totalorder %s21_s14, 0  ;;  %p32_p2 = scmp.eq.s32.totalorder %s383_s9, 0 }
   0x9   : > { %p37_p3 = scmp.ne.s32.totalorder %s375_s7, %s371_s6  ;;  %p38_p4 = scmp.eq.s32.totalorder %s418_s10, 0 }
   0xa   : > { %s434_s15 = scalar_select %p22_p1, %s379_s8, %s24_s13  }
   0xb   : > { %p436_p5 = por %p32_p2, %p31_p0  ;;  %p440_p6 = por %p38_p4, %p37_p3 }
   0xc   : > { %p61_p7 = scmp.eq.s32.totalorder %s418_s10, 1  ;;  %p67_p8 = scmp.eq.s32.totalorder %s229_s11, 1 }
   0xd   : > { %s549_s17 = scalar_select %p440_p6, 1, 0 }
   0xe   : > { %p253_p10 = scmp.lt.s32.totalorder %s383_s9, 2  ;;  %p447_p11 = por %p61_p7, %p31_p0 }
   0xf   : > { %p451_p12 = por %p67_p8, %p37_p3  ;;  %s87_s20 = sand.u32 1, %s379_s8  }
  0x10   : > { %s550_s18 = scalar_select %p447_p11, 1, 0 }
  0x11   : > { %s551_s19 = scalar_select %p451_p12, 1, 0 }
  0x12   : > { %s233_s21 = sshll.u32 %s383_s9, 7  ;;  %s232_s22 = sshll.u32 %s87_s20, 3 }
  0x13   : > { %s460_s25 = scalar_lea.hbm %s544_s0, %s233_s21  ;;  %s91_s26 = scalar_lea.vmem [#allocation2], %s232_s22 }
  0x14   : > { %s98_s27 = sshll.u32 %s91_s26, 4  ;;  %p464_p13 = pnand %p253_p10, %p436_p5  ;;  %s468_s27 = int_to_ptr.vmem [resolvable:$true] %s98_s27 }
  0x15   : > { %s88_s29 = scalar_lea.sflag [#allocation3], %s87_s20  ;;  %s291_s30 = scalar_lea.hbm %s460_s25, 128 }
  0x16   : > { %p292_p2 = scmp.ne.s32.totalorder %s460_s25, %s291_s30  ;;  %p293_p3 = pneg %p464_p13 }
  0x17   : > { %s296_s4 = scalar_lea.hbm %s544_s0, 256  ;;  %p297_p5 = scmp.lt.s32.totalorder %s460_s25, %s544_s0 }
  0x18   : > { %p294_p4 = pnand %p293_p3, %p292_p2  ;;  %p298_p8 = scmp.lt.s32.totalorder %s296_s4, %s291_s30 }
  0x1a   : > { %p295_p7 = pneg %p294_p4  ;;  %p299_p10 = por %p298_p8, %p297_p5 }
  0x1c   : > { %p300_p9 = pnand %p299_p10, %p295_p7 }
  0x1e   : > { %303 = shalt.err (!%p300_p9)
}
  0x1f   : > { %s304_s13 = scalar_lea.vmem %s468_s27, 128  ;;  %s385_s14 = smov [#allocation2]  }
  0x20   : > { %p305_p0 = scmp.ne.s32.totalorder %s468_s27, %s304_s13  ;;  %s309_s16 = sshll.u32 %s385_s14, 4  ;;  %s310_s16 = int_to_ptr.vmem [resolvable:$false] %s309_s16 }
  0x21   : > { %s311_s20 = scalar_lea.vmem %s310_s16, 256  ;;  %p312_p4 = scmp.lt.s32.totalorder %s468_s27, %s310_s16 }
  0x22   : > { %p307_p1 = pnand %p305_p0, %p293_p3  ;;  %p313_p12 = scmp.lt.s32.totalorder %s311_s20, %s304_s13 }
  0x24   : > { %p308_p2 = pneg %p307_p1  ;;  %p314_p11 = por %p313_p12, %p312_p4 }
  0x26   : > { %p315_p6 = pnand %p314_p11, %p308_p2 }
  0x28   : > { %318 = shalt.err (!%p315_p6)
}
  0x29   : > { %248 = dma.hbm_to_vmem [thread:$0]  (!%p464_p13), %s460_s25, 128, %s468_s27, %s88_s29  }
  0x2a   : > { %p553_p9 = scmp.lt.s32.totalorder %s383_s9, 3  ;;  %p554_p7 = scmp.ge.s32.totalorder %s383_s9, 1 }
  0x2c   : > { %p104_p0 = pnand %p554_p7, %p553_p9 }
  0x2d   : > { %s495_s21 = sand.u32 (!%p104_p0), 1, %s375_s7   ;;  %p555_p6 = scmp.ne.s32.totalorder (!%p104_p0), %s549_s17, 0 }
  0x2e   : > { %107 = sbr.rel (%p104_p0) target bundleno = 109 (0x6d), region = 24  ;;  %s235_s22 = sshll.u32 (!%p104_p0), %s495_s21, 3 }
  0x2f   : > { %s110_s23 = scalar_lea.sflag (!%p104_p0), [#allocation3], %s495_s21  ;;  %s113_s24 = scalar_lea.vmem (!%p104_p0), [#allocation2], %s235_s22 }
  0x33   : > { %362 = dma.done.wait (%p555_p6), %s110_s23, 128  }
  0x34   : > { %364 = vsyncadd (%p555_p6), %s110_s23, 4294967168  ;;  %v132_v0 = vld [vmem:[%s113_s24] sm:$0xff]  ;;  %s131_s25 = scalar_lea.vmem [#allocation5], %s235_s22  ;;  %s238_s27 = sshll.u32 %s418_s10, 7 }
  0x35   : > { %v133_v1 = vmin.f32 %v132_v0, 20.0  ;;  %s159_s26 = sshll.u32 %s131_s25, 4  ;;  %vm141_vm0 = vcmp.gt.f32.partialorder %v132_v0, 20.0  ;;  %s157_s29 = scalar_lea.hbm %s545_s1, %s238_s27  ;;  %s504_s26 = int_to_ptr.vmem [resolvable:$true] %s159_s26 }
  0x36   : > { %s146_s30 = scalar_lea.sflag [#allocation4], %s495_s21  ;;  %s319_s2 = scalar_lea.vmem %s504_s26, 128 }
  0x37   : > { %v134_v2 = vmul.f32 1.442695, %v133_v1  ;;  %p320_p11 = scmp.ne.s32.totalorder %s504_s26, %s319_s2  ;;  %p556_p12 = scmp.ne.s32.totalorder %s550_s18, 0 }
  0x38   : > { %s386_s10 = smov [#allocation5]  }
  0x39   : > { %287 = vpow2.f32 %v134_v2  ;;  %p321_p13 = pnand %p320_p11, %p556_p12  ;;  %s323_s3 = sshll.u32 %s386_s10, 4  ;;  %s324_s3 = int_to_ptr.vmem [resolvable:$false] %s323_s3 }
  0x3a   : > { %s325_s4 = scalar_lea.vmem %s324_s3, 256  ;;  %p326_p3 = scmp.lt.s32.totalorder %s504_s26, %s324_s3 }
  0x3b   : > { %p322_p1 = pneg %p321_p13  ;;  %p327_p5 = scmp.lt.s32.totalorder %s325_s4, %s319_s2 }
  0x3d   : > { %p328_p8 = por %p327_p5, %p326_p3 }
  0x3f   : > { %p329_p10 = pnand %p328_p8, %p322_p1 }
  0x46   : > { %v288_v3 = vpop.eup %287 }
  0x47   : > { %v136_v4 = vadd.f32 2.0, %v288_v3 }
  0x49   : > { %v137_v5 = vmul.f32 %v288_v3, %v136_v4 }
  0x4b   : > { %v138_v6 = vadd.f32 2.0, %v137_v5 }
  0x4d   : > { %289 = vrcp.f32 %v138_v6 }
  0x5a   : > { %v290_v7 = vpop.eup %289 }
  0x5b   : > { %v140_v8 = vmul.f32 %v290_v7, %v137_v5 }
  0x5d   : > { %v142_v9 = vmul.f32 %v140_v8, %v132_v0 }
  0x5f   : > { %v143_v10 = vsel %vm141_vm0, %v132_v0, %v142_v9 }
  0x60   : > { %144 = vst [vmem:[%s131_s25] sm:$0xff] %v143_v10 }
  0x61   : > { %332 = shalt.err (!%p329_p10)
}
  0x62   : > { %s333_s5 = scalar_lea.hbm %s157_s29, 128  ;;  %s337_s14 = scalar_lea.hbm %s545_s1, 256 }
  0x63   : > { %p334_p2 = scmp.ne.s32.totalorder %s157_s29, %s333_s5  ;;  %p338_p7 = scmp.lt.s32.totalorder %s157_s29, %s545_s1 }
  0x64   : > { %p339_p0 = scmp.lt.s32.totalorder %s337_s14, %s333_s5 }
  0x65   : > { %p335_p4 = pnand %p334_p2, %p556_p12 }
  0x66   : > { %p340_p6 = por %p339_p0, %p338_p7 }
  0x67   : > { %p336_p9 = pneg %p335_p4 }
  0x69   : > { %p341_p11 = pnand %p340_p6, %p336_p9 }
  0x6b   : > { %344 = shalt.err (!%p341_p11)
}
  0x6c   : > { %243 = dma.vmem_to_hbm [thread:$0]  (%p556_p12), %s504_s26, 128, %s157_s29, %s146_s30  }
  0x6d PF: > { %s171_s21 = sand.u32 1, %s371_s6   ;;  %p557_p13 = scmp.ne.s32.totalorder %s551_s19, 0 }
  0x6e   : > { %p558_p1 = scmp.ge.s32.totalorder %s383_s9, 2  ;;  %s172_s22 = scalar_lea.sflag [#allocation4], %s171_s21 }
  0x70   : > { %p250_p3 = pnand %p558_p1, %p557_p13 }
  0x72   : > { %p251_p5 = pneg %p250_p3 }
  0x74   : > { %366 = dma.done.wait (%p251_p5), %s172_s22, 128  }
  0x75   : > { %368 = vsyncadd (%p251_p5), %s172_s22, 4294967168  ;;  %p14_p8 = scmp.ge.s32.totalorder %s422_s12, 4   ;;  %s559_s6 = smov %s375_s7 }
  0x76   : > { %s560_s7 = smov %s379_s8  ;;  %s561_s8 = smov %s434_s15 }
  0x77   : > { %s562_s9 = smov %s422_s12  ;;  %16 = sbr.rel (!%p14_p8) target bundleno = 5 (0x5), region = 69 }
  0x7c   :  { %177 = vsyncpa [#allocation3], 1 }
  0x7d   :  { %179 = vsyncpa [#allocation3 + $0x1], 1 }
  0x7e   :  { %180 = vsyncpa [#allocation4], 1 }
  0x7f   :  { %182 = vsyncpa [#allocation4 + $0x1], 1 }

</bundles_post_ra>
